<compile_context>
chip_gen: v6e
topology: v6e:2x2x1
jax: 0.10.0
libtpu: 0.0.40
codegen_flags: <defaults>
</compile_context>

<pallas_src>
import jax
import jax.numpy as jnp
from jax.experimental import pallas as pl
from jax.experimental.pallas import tpu as pltpu

COLS = 1024            # lane-dense slab width (8 vregs / row)
MAX_BLOCK_ROWS = 512   # 512 * 1024 * 4 B = 2 MiB per f32 block


def _round_up(x, m):
    return (x + m - 1) // m * m


def _partial_minmax_kernel(x_ref, min_ref, max_ref):
    """Stage-1 reduction: one (min, max) pair per grid block ("parallel" grid,
    so v7x can shard the blocks across both TensorCores)."""
    x = x_ref[...].astype(jnp.float32)
    min_ref[...] = jnp.min(x, axis=(0, 1), keepdims=True)
    max_ref[...] = jnp.max(x, axis=(0, 1), keepdims=True)


def _apply_kernel(stats_ref, x_ref, o_ref):
    """Elementwise rescale: o = (x - min) * (1 / (max - min)).

    The divide is hoisted to a single exact scalar reciprocal per grid step;
    the per-element work is one subtract + one multiply (FMA-friendly), so the
    pass stays cleanly HBM/DMA-bound.
    """
    imin = stats_ref[0]
    imax = stats_ref[1]
    scale = 1.0 / (imax - imin)          # exact scalar divide (not approx)
    x = x_ref[...].astype(jnp.float32)
    o_ref[...] = ((x - imin) * scale).astype(o_ref.dtype)


def _make_slab(x):
    """Flatten to a single lane-dense (rows, COLS) slab in the original dtype.

    Padding uses the first element (neutral for global min/max); the padded
    region of the output is sliced off by the wrapper.  Returns
    (slab, n_valid, block_rows).
    """
    flat = x.reshape(-1)
    n = flat.shape[0]
    rows_needed = pl.cdiv(n, COLS)
    if rows_needed <= MAX_BLOCK_ROWS:
        # Small tensor: one block covering the whole (8-row aligned) slab.
        block_rows = max(8, _round_up(rows_needed, 8))
        rows = block_rows
    else:
        block_rows = MAX_BLOCK_ROWS
        rows = _round_up(rows_needed, block_rows)
    pad = rows * COLS - n
    if pad:
        flat = jnp.concatenate(
            [flat, jnp.full((pad,), flat[0], dtype=flat.dtype)])
    return flat.reshape(rows, COLS), n, block_rows


def norm_layer(inp):
    """Pallas implementation of NormLayer.forward(inp)."""
    orig_shape = inp.shape
    orig_dtype = inp.dtype

    slab, n, block_rows = _make_slab(inp)
    rows = slab.shape[0]
    nblk = rows // block_rows

    # --- Pass 1: per-block partial min/max (parallel grid), tiny final reduce.
    pmin, pmax = pl.pallas_call(
        _partial_minmax_kernel,
        out_shape=(
            jax.ShapeDtypeStruct((nblk, 1), jnp.float32),
            jax.ShapeDtypeStruct((nblk, 1), jnp.float32),
        ),
        grid=(nblk,),
        in_specs=[pl.BlockSpec((block_rows, COLS), lambda i: (i, 0))],
        out_specs=(
            pl.BlockSpec((1, 1), lambda i: (i, 0)),
            pl.BlockSpec((1, 1), lambda i: (i, 0)),
        ),
        compiler_params=pltpu.CompilerParams(
            dimension_semantics=("parallel",)),
    )(slab)

    imin = jnp.min(pmin)
    imax = jnp.max(pmax)
    stats = jnp.stack([imin, imax])          # (2,) f32, lives in SMEM below

    # --- Pass 2: elementwise rescale on the same slab, scalars from SMEM.
    out_slab = pl.pallas_call(
        _apply_kernel,
        out_shape=jax.ShapeDtypeStruct((rows, COLS), orig_dtype),
        grid=(nblk,),
        in_specs=[
            pl.BlockSpec(memory_space=pltpu.MemorySpace.SMEM),   # (min, max)
            pl.BlockSpec((block_rows, COLS), lambda i: (i, 0)),
        ],
        out_specs=pl.BlockSpec((block_rows, COLS), lambda i: (i, 0)),
        compiler_params=pltpu.CompilerParams(
            dimension_semantics=("parallel",)),
    )(stats, slab)

    return out_slab.reshape(-1)[:n].reshape(orig_shape)


if __name__ == "__main__":
    key = jax.random.PRNGKey(0)
    inp = jax.random.normal(key, (2, 4, 16, 16), dtype=jnp.float32)

    out = norm_layer(inp)
    out = jax.block_until_ready(out)

    # Pure-JAX reference mirroring the PyTorch forward.
    t = inp - inp.min()
    expected = t / t.max()

    assert out.shape == inp.shape and out.dtype == inp.dtype
    assert jnp.allclose(out, expected, atol=1e-5, rtol=1e-5)

    print("KERNEL_OK")
</pallas_src>

<mosaic_0001>
module attributes {stable_mosaic.version = 11 : i64} {
  func.func @_partial_minmax_kernel(%arg0: i32, %arg1: memref<8x1024xf32, #tpu.memory_space<vmem>>, %arg2: memref<1x1xf32, #tpu.memory_space<vmem>>, %arg3: memref<1x1xf32, #tpu.memory_space<vmem>>) attributes {dimension_semantics = [#tpu.dimension_semantics<parallel>], iteration_bounds = array<i64: 1>, scalar_prefetch = 0 : i64, scratch_operands = 0 : i64, tpu.core_type = #tpu.core_type<tc>, window_params = [{transform_indices = @transform_0, window_bounds = array<i64: 8, 1024>}, {transform_indices = @transform_1, window_bounds = array<i64: 1, 1>}, {transform_indices = @transform_2, window_bounds = array<i64: 1, 1>}]} {
    %c0 = arith.constant 0 : index
    %c0_0 = arith.constant 0 : index
    %0 = vector.load %arg1[%c0, %c0_0] : memref<8x1024xf32, #tpu.memory_space<vmem>>, vector<8x1024xf32>
    %1 = vector.shape_cast %0 : vector<8x1024xf32> to vector<1x8x1024xf32>
    %cst = arith.constant dense<0x7F800000> : vector<1xf32>
    %2 = vector.multi_reduction <minimumf>, %1, %cst [1, 2] : vector<1x8x1024xf32> to vector<1xf32>
    %3 = vector.shape_cast %2 : vector<1xf32> to vector<1x1x1xf32>
    %4 = vector.extract %3[0, 0, 0] : f32 from vector<1x1x1xf32>
    %5 = vector.broadcast %4 : f32 to vector<1x1xf32>
    %c0_1 = arith.constant 0 : index
    %c0_2 = arith.constant 0 : index
    %6 = vector.load %arg2[%c0_1, %c0_2] : memref<1x1xf32, #tpu.memory_space<vmem>>, vector<1x1xf32>
    tpu.vector_store %arg2[%c0_1, %c0_2], %5 {strides = array<i32>} : memref<1x1xf32, #tpu.memory_space<vmem>>, vector<1x1xf32>,
    %7 = vector.shape_cast %0 : vector<8x1024xf32> to vector<1x8x1024xf32>
    %cst_3 = arith.constant dense<0xFF800000> : vector<1xf32>
    %8 = vector.multi_reduction <maximumf>, %7, %cst_3 [1, 2] : vector<1x8x1024xf32> to vector<1xf32>
    %9 = vector.shape_cast %8 : vector<1xf32> to vector<1x1x1xf32>
    %10 = vector.extract %9[0, 0, 0] : f32 from vector<1x1x1xf32>
    %11 = vector.broadcast %10 : f32 to vector<1x1xf32>
    %c0_4 = arith.constant 0 : index
    %c0_5 = arith.constant 0 : index
    %12 = vector.load %arg3[%c0_4, %c0_5] : memref<1x1xf32, #tpu.memory_space<vmem>>, vector<1x1xf32>
    tpu.vector_store %arg3[%c0_4, %c0_5], %11 {strides = array<i32>} : memref<1x1xf32, #tpu.memory_space<vmem>>, vector<1x1xf32>,
    return
  }
  func.func @transform_0(%arg0: i32) -> (i32, i32) {
    %c0_i32 = arith.constant 0 : i32
    %c0_i32_0 = arith.constant 0 : i32
    return %arg0, %c0_i32 : i32, i32
  }
  func.func @transform_1(%arg0: i32) -> (i32, i32) {
    %c0_i32 = arith.constant 0 : i32
    %c0_i32_0 = arith.constant 0 : i32
    return %arg0, %c0_i32 : i32, i32
  }
  func.func @transform_2(%arg0: i32) -> (i32, i32) {
    %c0_i32 = arith.constant 0 : i32
    %c0_i32_0 = arith.constant 0 : i32
    return %arg0, %c0_i32 : i32, i32
  }
}

</mosaic_0001>

<bundles_post_ra>
// kernel: tpu_custom_call.1
= control target key start
LH: loop header
LB: loop body
LE: loop exit
PB: predicated region body
PF: predicated region fallthrough
CT: control target
= control target key end

     0   :  { %8 = vsyncpa [#allocation3], 0  ;;  %s200_s0 = inlined_call_operand.hbm [shape: f32[8,1024], index: 0, kind: input, shape index: {}]   ;;  %s201_s1 = inlined_call_operand.hbm [shape: f32[1,1], index: 1, kind: output, shape index: {0}]   ;;  %s202_s2 = inlined_call_operand.hbm [shape: f32[1,1], index: 2, kind: output, shape index: {1}]  }
   0x1   :  { %9 = vsyncpa [#allocation4], 0 }
   0x2   :  { %10 = vsyncpa [#allocation7], 0  ;;  %s171_s9 = smov [#allocation2]  }
   0x3   :  { %s17_s10 = sshll.u32 %s171_s9, 4  ;;  %s18_s10 = int_to_ptr.vmem [resolvable:$true] %s17_s10 }
   0x4   :  { %s113_s11 = scalar_lea.vmem %s18_s10, 1024  ;;  %p118_p1 = scmp.lt.s32.totalorder %s18_s10, %s18_s10 }
   0x5   :  { %p114_p0 = scmp.ne.s32.totalorder %s18_s10, %s113_s11  ;;  %p119_p2 = scmp.lt.s32.totalorder %s113_s11, %s113_s11 }
   0x7   :  { %p120_p3 = por %p119_p2, %p118_p1 }
   0x9   :  { %p121_p4 = pnand %p120_p3, %p114_p0 }
   0xb   :  { %124 = shalt.err (!%p121_p4)
}
   0xc   :  { %20 = dma.hbm_to_vmem [thread:$0]  %s200_s0, 1024, %s18_s10, [#allocation3]  }
   0xd   :  { %165 = dma.done.wait [#allocation3], 1024  }
   0xe   :  { %166 = vsyncadd [#allocation3], 4294966272  ;;  %v24_v0 = vld [vmem:[#allocation2] sm:$0xff]  ;;  %v25_v1 = vld [vmem:[#allocation2 + $0x8] sm:$0xff]  ;;  %s172_s0 = smov [#allocation5]   ;;  %vm49_vm0 = vcmask 0  }
   0xf   :  { %v26_v2 = vld [vmem:[#allocation2 + $0x10] sm:$0xff]  ;;  %v27_v3 = vld [vmem:[#allocation2 + $0x18] sm:$0xff]  ;;  %v28_v4 = vld [vmem:[#allocation2 + $0x20] sm:$0xff]  ;;  %s75_s14 = sshll.u32 %s172_s0, 4  ;;  %s173_s16 = smov [#allocation6]   ;;  %s76_s14 = int_to_ptr.vmem [resolvable:$true] %s75_s14 }
  0x10   :  { %v29_v5 = vld [vmem:[#allocation2 + $0x28] sm:$0xff]  ;;  %v30_v6 = vld [vmem:[#allocation2 + $0x30] sm:$0xff]  ;;  %v31_v7 = vld [vmem:[#allocation2 + $0x38] sm:$0xff]  ;;  %v32_v8 = vmin.f32 %v24_v0, %v28_v4  ;;  %v51_v10 = vmax.f32 %v24_v0, %v28_v4  ;;  %s85_s17 = sshll.u32 %s173_s16, 4  ;;  %s125_s18 = scalar_lea.vmem %s76_s14, 16  ;;  %s86_s17 = int_to_ptr.vmem [resolvable:$true] %s85_s17 }
  0x11   :  { %v33_v9 = vmin.f32 %v25_v1, %v29_v5  ;;  %v52_v11 = vmax.f32 %v25_v1, %v29_v5  ;;  %v34_v12 = vmin.f32 %v26_v2, %v30_v6  ;;  %v35_v13 = vmin.f32 %v27_v3, %v31_v7  ;;  %p126_p5 = scmp.ne.s32.totalorder %s76_s14, %s125_s18  ;;  %s129_s19 = scalar_lea.vmem %s76_s14, 32 }
  0x12   :  { %v53_v14 = vmax.f32 %v26_v2, %v30_v6  ;;  %v54_v15 = vmax.f32 %v27_v3, %v31_v7  ;;  %p130_p6 = scmp.lt.s32.totalorder %s76_s14, %s76_s14  ;;  %p131_p7 = scmp.lt.s32.totalorder %s129_s19, %s125_s18 }
  0x13   :  { %v36_v16 = vmin.f32 %v32_v8, %v33_v9  ;;  %v37_v17 = vmin.f32 %v34_v12, %v35_v13  ;;  %v55_v18 = vmax.f32 %v51_v10, %v52_v11 }
  0x14   :  { %v56_v19 = vmax.f32 %v53_v14, %v54_v15  ;;  %p132_p8 = por %p131_p7, %p130_p6 }
  0x15   :  { %v38_v20 = vmin.f32 %v36_v16, %v37_v17 }
  0x16   :  { %v57_v21 = vmax.f32 %v55_v18, %v56_v19  ;;  %p133_p9 = pnand %p132_p8, %p126_p5 }
  0x17   :  { %39 = vmin.xlane.f32.xlu0 %v38_v20 }
  0x1b   :  { %58 = vmax.xlane.f32.xlu0 %v57_v21 }
  0xa0   :  { %v40_v22 = vpop.xlane.xlu0 %39 }
  0xa1   :  { %v41_v23 = vrot.slane %v40_v22, 4 }
  0xa3   :  { %v42_v24 = vmin.f32 %v40_v22, %v41_v23 }
  0xa4   :  { %v59_v25 = vpop.xlane.xlu0 %58 }
  0xa5   :  { %v43_v26 = vrot.slane %v42_v24, 2  ;;  %v60_v27 = vrot.slane %v59_v25, 4 }
  0xa7   :  { %v61_v28 = vmax.f32 %v59_v25, %v60_v27  ;;  %v44_v29 = vmin.f32 %v42_v24, %v43_v26 }
  0xa9   :  { %v62_v30 = vrot.slane %v61_v28, 2  ;;  %v45_v31 = vrot.slane %v44_v29, 1 }
  0xab   :  { %v63_v32 = vmax.f32 %v61_v28, %v62_v30  ;;  %v46_v33 = vmin.f32 %v44_v29, %v45_v31 }
  0xad   :  { %98 = vpush %v46_v33  ;;  %v64_v34 = vrot.slane %v63_v32, 1 }
  0xaf   :  { %v65_v35 = vmax.f32 %v63_v32, %v64_v34 }
  0xb1   :  { %100 = vpush %v65_v35 }
  0xde   :  { %s99_s15 = spop %98 }
  0xdf   :  { %v48_v36 = vstv %s99_s15 }
  0xe0   :  { %50 = vst.msk [vmem:[#allocation5] sm:$0x1] %vm49_vm0, %v48_v36 }
  0xe1   :  { %136 = shalt.err (!%p133_p9)
}
  0xe2   :  { %78 = dma.vmem_to_hbm [thread:$0]  %s76_s14, 16, %s201_s1, [#allocation4]  }
  0xe3   :  { %s101_s22 = spop %100  ;;  %s145_s23 = scalar_lea.vmem %s86_s17, 16 }
  0xe4   :  { %v67_v37 = vstv %s101_s22  ;;  %p146_p10 = scmp.ne.s32.totalorder %s86_s17, %s145_s23  ;;  %s149_s24 = scalar_lea.vmem %s86_s17, 32 }
  0xe5   :  { %68 = vst.msk [vmem:[#allocation6] sm:$0x1] %vm49_vm0, %v67_v37  ;;  %p150_p11 = scmp.lt.s32.totalorder %s86_s17, %s86_s17  ;;  %p151_p12 = scmp.lt.s32.totalorder %s149_s24, %s145_s23 }
  0xe7   :  { %p152_p13 = por %p151_p12, %p150_p11 }
  0xe9   :  { %p153_p0 = pnand %p152_p13, %p146_p10 }
  0xeb   :  { %156 = shalt.err (!%p153_p0)
}
  0xec   :  { %88 = dma.vmem_to_hbm [thread:$0]  %s86_s17, 16, %s202_s2, [#allocation7]  }
  0xed   :  { %167 = dma.done.wait [#allocation4], 16  }
  0xee   :  { %168 = vsyncadd [#allocation4], 4294967280 }
  0xef   :  { %169 = dma.done.wait [#allocation7], 16  }
  0xf0   :  { %170 = vsyncadd [#allocation7], 4294967280 }
  0xf1   :  { %95 = vsyncpa [#allocation3], 1 }
  0xf2   :  { %96 = vsyncpa [#allocation4], 1 }
  0xf3   :  { %97 = vsyncpa [#allocation7], 1 }

</bundles_post_ra>
